<compile_context>
chip_gen: v5e
topology: v5e:2x2
jax: 0.10.0
libtpu: 0.0.40
codegen_flags: <defaults>
</compile_context>

<pallas_src>
import functools

import jax
import jax.numpy as jnp
from jax.experimental import pallas as pl
from jax.experimental.pallas import tpu as pltpu


def _ce_label_smooth_kernel(logits_ref, targets_ref, out_ref, *,
                            epsilon, num_rows):
    # logits_ref:  (TILE_B, C) float   targets_ref: (TILE_B, 1) int32
    # out_ref:     (1, 8, 128) f32  -- this tile's partial sum, lane/sublane broadcast
    tile_b, num_classes = logits_ref.shape

    x = logits_ref[...].astype(jnp.float32)                      # (TILE_B, C)
    t = targets_ref[...]                                         # (TILE_B, 1) int32

    # Numerically stable per-row statistics (class axis = lane axis).
    m = jnp.max(x, axis=1, keepdims=True)                        # (TILE_B, 1)
    z = x - m
    lse = jnp.log(jnp.sum(jnp.exp(z), axis=1, keepdims=True))    # (TILE_B, 1)
    sum_z = jnp.sum(z, axis=1, keepdims=True)                    # (TILE_B, 1)

    # Logit at the target column via a (1, C) lane iota broadcast against the
    # (TILE_B, 1) targets -- no full-tile int32 tensor is materialized.
    col = jax.lax.broadcasted_iota(jnp.int32, (1, num_classes), 1)
    x_t = jnp.sum(jnp.where(col == t, x, 0.0), axis=1, keepdims=True)
    z_t = x_t - m                                                # (TILE_B, 1)

    # loss_i = (1-eps)*(lse_i - z[i, t_i]) + eps*lse_i - (eps/C)*sum_j z[i, j]
    eps = jnp.float32(epsilon)
    loss_row = ((1.0 - eps) * (lse - z_t)
                + eps * lse
                - (eps / num_classes) * sum_z)                   # (TILE_B, 1)

    if num_rows % tile_b != 0:
        # Only the partial last tile ever has invalid rows; garbage there stays
        # confined to per-row stats and is zeroed here before the batch sum.
        row = (jax.lax.broadcasted_iota(jnp.int32, (tile_b, 1), 0)
               + pl.program_id(0) * tile_b)
        loss_row = jnp.where(row < num_rows, loss_row, 0.0)

    partial = jnp.sum(loss_row, axis=0, keepdims=True)           # (1, 1)
    out_ref[0] = jnp.broadcast_to(partial, (8, 128))


def _choose_tile_b(batch, num_classes):
    """Batch tile sized by the f32 working set (~8 MiB lane-padded), multiple of 8."""
    c_padded = max(128, ((num_classes + 127) // 128) * 128)
    target_f32_bytes = 8 * 1024 * 1024
    rows = target_f32_bytes // (c_padded * 4)
    rows = max(8, (rows // 8) * 8)
    rows = min(rows, 2048)
    if batch <= rows:
        return int(batch)
    return int(rows)


def cross_entropy_label_smooth(logits, targets, *, epsilon=0.1, tile_b=None):
    """Pallas equivalent of CrossEntropyLabelSmooth.forward (alpha=None path).

    logits:  (batch_size, num_classes) float array (pre-softmax scores)
    targets: (batch_size,) int class labels
    returns: scalar float32 loss
    """
    B, C = logits.shape
    if tile_b is None:
        tile_b = _choose_tile_b(B, C)
    tile_b = max(1, min(int(tile_b), B))
    num_tiles = pl.cdiv(B, tile_b)

    targets2d = targets.reshape(B, 1).astype(jnp.int32)
    itemsize = int(jnp.dtype(logits.dtype).itemsize)

    grid_spec = pltpu.PrefetchScalarGridSpec(
        num_scalar_prefetch=0,
        grid=(num_tiles,),
        in_specs=[
            pl.BlockSpec((tile_b, C), lambda i: (i, 0)),    # logits tile
            pl.BlockSpec((tile_b, 1), lambda i: (i, 0)),    # targets tile
        ],
        # One independent lane-dense partial-sum block per tile.
        out_specs=pl.BlockSpec((1, 8, 128), lambda i: (i, 0, 0)),
    )

    cost = pl.CostEstimate(
        flops=6 * B * C,
        transcendentals=B * C + 2 * B,
        bytes_accessed=B * C * itemsize + B * 4 + num_tiles * 8 * 128 * 4,
    )

    partials = pl.pallas_call(
        functools.partial(_ce_label_smooth_kernel,
                          epsilon=float(epsilon), num_rows=B),
        out_shape=jax.ShapeDtypeStruct((num_tiles, 8, 128), jnp.float32),
        grid_spec=grid_spec,
        compiler_params=pltpu.CompilerParams(
            dimension_semantics=("parallel",),    # independent tiles -> both TCs on v7x
            vmem_limit_bytes=48 * 1024 * 1024,    # fits v7x's 64 MiB VMEM
        ),
        cost_estimate=cost,
    )(logits, targets2d)

    # Tiny finalize in plain JAX: sum per-tile partials, scale by 1/B (mean over batch).
    return jnp.sum(partials[:, 0, 0]) * jnp.float32(1.0 / B)


def _reference(logits, targets, epsilon=0.1):
    B, C = logits.shape
    log_probs = jax.nn.log_softmax(logits.astype(jnp.float32), axis=1)
    onehot = jax.nn.one_hot(targets, C, dtype=jnp.float32)
    q = (1.0 - epsilon) * onehot + epsilon / C
    return jnp.sum(jnp.mean(-q * log_probs, axis=0))


if __name__ == "__main__":
    key = jax.random.PRNGKey(0)
    k_logits, k_targets = jax.random.split(key)

    # Small shapes consistent with the module's forward signature.
    batch_size, num_classes = 8, 16
    logits = jax.random.normal(k_logits, (batch_size, num_classes), dtype=jnp.float32)
    targets = jax.random.randint(k_targets, (batch_size,), 0, num_classes,
                                 dtype=jnp.int32)

    loss = cross_entropy_label_smooth(logits, targets, epsilon=0.1)
    loss = jax.block_until_ready(loss)
    ref = _reference(logits, targets, epsilon=0.1)
    assert jnp.allclose(loss, ref, rtol=1e-5, atol=1e-5), (loss, ref)

    # Second check: multi-tile grid with a partial last tile (B not divisible by
    # tile_b), exercising the per-tile partial outputs and the row mask.
    k3, k4 = jax.random.split(k_logits)
    B2, C2 = 20, 128
    logits2 = jax.random.normal(k3, (B2, C2), dtype=jnp.float32)
    targets2 = jax.random.randint(k4, (B2,), 0, C2, dtype=jnp.int32)
    loss2 = cross_entropy_label_smooth(logits2, targets2, epsilon=0.1, tile_b=8)
    loss2 = jax.block_until_ready(loss2)
    ref2 = _reference(logits2, targets2, epsilon=0.1)
    assert jnp.allclose(loss2, ref2, rtol=1e-5, atol=1e-5), (loss2, ref2)

    print("KERNEL_OK")
</pallas_src>

<mosaic_0001>
module attributes {stable_mosaic.version = 11 : i64} {
  func.func @_ce_label_smooth_kernel(%arg0: i32, %arg1: memref<8x16xf32, #tpu.memory_space<vmem>>, %arg2: memref<8x1xi32, #tpu.memory_space<vmem>>, %arg3: memref<1x8x128xf32, #tpu.memory_space<vmem>>) attributes {dimension_semantics = [#tpu.dimension_semantics<parallel>], iteration_bounds = array<i64: 1>, scalar_prefetch = 0 : i64, scratch_operands = 0 : i64, tpu.core_type = #tpu.core_type<tc>, window_params = [{transform_indices = @transform_0, window_bounds = array<i64: 8, 16>}, {transform_indices = @transform_1, window_bounds = array<i64: 8, 1>}, {transform_indices = @transform_2, window_bounds = array<i64: 1, 8, 128>}]} {
    %c0 = arith.constant 0 : index
    %c0_0 = arith.constant 0 : index
    %0 = vector.load %arg1[%c0, %c0_0] : memref<8x16xf32, #tpu.memory_space<vmem>>, vector<8x16xf32>
    %c0_1 = arith.constant 0 : index
    %c0_2 = arith.constant 0 : index
    %1 = vector.load %arg2[%c0_1, %c0_2] : memref<8x1xi32, #tpu.memory_space<vmem>>, vector<8x1xi32>
    %cst = arith.constant dense<0xFF800000> : vector<8xf32>
    %2 = vector.multi_reduction <maximumf>, %0, %cst [1] : vector<8x16xf32> to vector<8xf32>
    %3 = vector.shape_cast %2 : vector<8xf32> to vector<8x1xf32>
    %4 = vector.broadcast %3 : vector<8x1xf32> to vector<8x16xf32>
    %5 = arith.subf %0, %4 : vector<8x16xf32>
    %6 = math.exp %5 : vector<8x16xf32>
    %cst_3 = arith.constant dense<0.000000e+00> : vector<8xf32>
    %7 = vector.multi_reduction <add>, %6, %cst_3 [1] : vector<8x16xf32> to vector<8xf32>
    %8 = vector.shape_cast %7 : vector<8xf32> to vector<8x1xf32>
    %9 = math.log %8 : vector<8x1xf32>
    %cst_4 = arith.constant dense<0.000000e+00> : vector<8xf32>
    %10 = vector.multi_reduction <add>, %5, %cst_4 [1] : vector<8x16xf32> to vector<8xf32>
    %11 = vector.shape_cast %10 : vector<8xf32> to vector<8x1xf32>
    %12 = tpu.iota {dimensions = array<i32: 1>} : vector<1x16xi32>
    %13 = vector.broadcast %12 : vector<1x16xi32> to vector<8x16xi32>
    %14 = vector.broadcast %1 : vector<8x1xi32> to vector<8x16xi32>
    %15 = arith.cmpi eq, %13, %14 : vector<8x16xi32>
    %cst_5 = arith.constant 0.000000e+00 : f32
    %16 = vector.broadcast %cst_5 : f32 to vector<8x16xf32>
    %17 = arith.select %15, %0, %16 : vector<8x16xi1>, vector<8x16xf32>
    %cst_6 = arith.constant dense<0.000000e+00> : vector<8xf32>
    %18 = vector.multi_reduction <add>, %17, %cst_6 [1] : vector<8x16xf32> to vector<8xf32>
    %19 = vector.shape_cast %18 : vector<8xf32> to vector<8x1xf32>
    %20 = arith.subf %19, %3 : vector<8x1xf32>
    %cst_7 = arith.constant 1.000000e+00 : f32
    %cst_8 = arith.constant 1.000000e-01 : f32
    %21 = arith.subf %cst_7, %cst_8 : f32
    %22 = arith.subf %9, %20 : vector<8x1xf32>
    %23 = vector.broadcast %21 : f32 to vector<8x1xf32>
    %24 = arith.mulf %23, %22 : vector<8x1xf32>
    %cst_9 = arith.constant 1.000000e-01 : f32
    %25 = vector.broadcast %cst_9 : f32 to vector<8x1xf32>
    %26 = arith.mulf %25, %9 : vector<8x1xf32>
    %27 = arith.addf %24, %26 : vector<8x1xf32>
    %cst_10 = arith.constant 1.000000e-01 : f32
    %cst_11 = arith.constant 1.600000e+01 : f32
    %28 = arith.divf %cst_10, %cst_11 : f32
    %29 = vector.broadcast %28 : f32 to vector<8x1xf32>
    %30 = arith.mulf %29, %11 : vector<8x1xf32>
    %31 = arith.subf %27, %30 : vector<8x1xf32>
    %cst_12 = arith.constant dense<0.000000e+00> : vector<1xf32>
    %32 = vector.multi_reduction <add>, %31, %cst_12 [0] : vector<8x1xf32> to vector<1xf32>
    %33 = vector.shape_cast %32 : vector<1xf32> to vector<1x1xf32>
    %34 = vector.shape_cast %33 : vector<1x1xf32> to vector<1x1xf32>
    %35 = vector.broadcast %34 : vector<1x1xf32> to vector<8x128xf32>
    %c0_13 = arith.constant 0 : index
    %c0_14 = arith.constant 0 : index
    %c0_15 = arith.constant 0 : index
    %36 = vector.load %arg3[%c0_13, %c0_14, %c0_15] : memref<1x8x128xf32, #tpu.memory_space<vmem>>, vector<1x8x128xf32>
    %37 = vector.shape_cast %36 : vector<1x8x128xf32> to vector<8x128xf32>
    %38 = vector.shape_cast %35 : vector<8x128xf32> to vector<1x8x128xf32>
    tpu.vector_store %arg3[%c0_13, %c0_14, %c0_15], %38 {strides = array<i32>} : memref<1x8x128xf32, #tpu.memory_space<vmem>>, vector<1x8x128xf32>,
    return
  }
  func.func @transform_0(%arg0: i32) -> (i32, i32) {
    %c0_i32 = arith.constant 0 : i32
    %c0_i32_0 = arith.constant 0 : i32
    return %arg0, %c0_i32 : i32, i32
  }
  func.func @transform_1(%arg0: i32) -> (i32, i32) {
    %c0_i32 = arith.constant 0 : i32
    %c0_i32_0 = arith.constant 0 : i32
    return %arg0, %c0_i32 : i32, i32
  }
  func.func @transform_2(%arg0: i32) -> (i32, i32, i32) {
    %c0_i32 = arith.constant 0 : i32
    %c0_i32_0 = arith.constant 0 : i32
    %c0_i32_1 = arith.constant 0 : i32
    return %arg0, %c0_i32, %c0_i32_0 : i32, i32, i32
  }
}

</mosaic_0001>

<bundles_post_ra>
// kernel: tpu_custom_call.1
= control target key start
LH: loop header
LB: loop body
LE: loop exit
PB: predicated region body
PF: predicated region fallthrough
CT: control target
= control target key end

     0   :  { %vm14_vm0 = vcmask 130048   ;;  %s132_s0 = inlined_call_operand.vmem [shape: f32[8,16], index: 0, kind: input, shape index: {}]   ;;  %s133_s1 = inlined_call_operand.vmem [shape: s32[8,1], index: 1, kind: input, shape index: {}]   ;;  %s134_s2 = inlined_call_operand.hbm [shape: f32[1,8,128], index: 2, kind: output, shape index: {}]  }
   0x1   :  { %v12_v0 = vld [vmem:[%s132_s0] sm:$0xff] }
   0x2   :  { %7 = vsyncpa [#allocation3], 0  ;;  %v15_v1 = vsel %vm14_vm0, %v12_v0, -inf  ;;  %v102_v2 = vmov 0   ;;  %v13_v3 = vld [vmem:[%s133_s1] sm:$0xff]  ;;  %v29_v10 = vlaneseq  ;;  %s103_s0 = smov [#allocation2]  }
   0x3   :  { %71 = vset.pattern.permute.xlu0 %v102_v2  ;;  %s58_s1 = sshll.u32 %s103_s0, 4  ;;  %s60_s15 = sshll.u32 %s134_s2, 4  ;;  %s59_s1 = int_to_ptr.vmem [resolvable:$true] %s58_s1  ;;  %s61_s15 = int_to_ptr.hbm [resolvable:$true] %s60_s15 }
   0x4   :  { %16 = vmax.xlane.f32.xlu0 %v15_v1  ;;  %v30_v11 = vand.u32 127, %v29_v10 }
  0x18   :  { %32 = vperm.xlu0 %71, %v13_v3  }
  0x77   :  { %v17_v4 = vpop.xlane.xlu0 %16 }
  0x78   :  { %v18_v5 = vsub.f32 %v12_v0, %v17_v4 }
  0x7a   :  { %v26_v6 = vsel %vm14_vm0, %v18_v5, 0.0  ;;  %v19_v7 = vmul.f32 1.442695, %v18_v5 }
  0x7b   :  { %27 = vadd.xlane.f32.xlu2 %v26_v6 }
  0x7c   :  { %72 = vpow2.f32 %v19_v7 }
  0x82   :  { %v73_v8 = vpop.eup %72 }
  0x83   :  { %v21_v9 = vsel %vm14_vm0, %v73_v8, 0.0 }
  0x84   :  { %22 = vadd.xlane.f32.xlu1 %v21_v9 }
  0x8a   :  { %v33_v12 = vpop.permute.xlu0 %32 }
  0x8b   :  { %vm34_vm1 = vcmp.eq.s32.totalorder %v30_v11, %v33_v12 }
  0x8c   :  { %v35_v13 = vsel %vm34_vm1, %v12_v0, 0.0 }
  0x8d   :  { %v36_v14 = vsel %vm14_vm0, %v35_v13, 0.0 }
  0x8e   :  { %37 = vadd.xlane.f32.xlu1 %v36_v14 }
  0xee   :  { %v28_v21 = vpop.xlane.xlu2 %27 }
  0xef   :  { %v44_v24 = vmul.f32 0.00625, %v28_v21 }
  0xf7   :  { %v23_v15 = vpop.xlane.xlu1 %22 }
  0xf8   :  { %74 = vlog2.f32 %v23_v15 }
  0xfe   :  { %v75_v16 = vpop.eup %74 }
  0xff   :  { %v25_v18 = vmul.f32 0.6931472, %v75_v16 }
 0x101   :  { %v38_v17 = vpop.xlane.xlu1 %37  ;;  %v42_v22 = vmul.f32 0.1, %v25_v18 }
 0x102   :  { %v39_v19 = vsub.f32 %v38_v17, %v17_v4 }
 0x104   :  { %v40_v20 = vsub.f32 %v25_v18, %v39_v19 }
 0x106   :  { %v41_v23 = vmul.f32 0.9, %v40_v20 }
 0x108   :  { %v43_v25 = vadd.f32 %v42_v22, %v41_v23 }
 0x10a   :  { %v45_v26 = vsub.f32 %v43_v25, %v44_v24 }
 0x10c   :  { %v46_v27 = vrot.slane %v45_v26, 4 }
 0x10e   :  { %v47_v28 = vadd.f32 %v46_v27, %v45_v26 }
 0x110   :  { %v48_v29 = vrot.slane %v47_v28, 2 }
 0x112   :  { %v49_v30 = vadd.f32 %v48_v29, %v47_v28 }
 0x114   :  { %v50_v31 = vrot.slane %v49_v30, 1 }
 0x116   :  { %v51_v32 = vadd.f32 %v50_v31, %v49_v30 }
 0x118   :  { %52 = vst [vmem:[#allocation2] sm:$0xff] %v51_v32 }
 0x119   :  { %63 = dma.vmem_to_hbm [thread:$0]  %s59_s1, 128, %s61_s15, [#allocation3]  }
 0x11a   :  { %100 = dma.done.wait [#allocation3], 128  }
 0x11b   :  { %101 = vsyncadd [#allocation3], 4294967168 }
 0x11c   :  { %68 = vsyncpa [#allocation3], 1 }

</bundles_post_ra>
